<compile_context>
chip_gen: v5e
topology: v5e:2x2
jax: 0.10.0
libtpu: 0.0.40
codegen_flags: <defaults>
</compile_context>

<pallas_src>
import jax
import jax.numpy as jnp
from jax import lax
from jax.experimental import pallas as pl
from jax.experimental.pallas import tpu as pltpu


def causal_kernel(ids1_ref, m1_ref, ids2_ref, m2_ref, wfold_ref, out_ref):
    """ids1_ref/ids2_ref: [B, L] int32 token ids (two streams)
       m1_ref/m2_ref:     [B, L] f32 masks
       wfold_ref:         [2V + 8, Y] f32  (rows 0:2V folded weights,
                          row 2V = folded bias, rows 2V+1.. zero padding)
       out_ref:           [B, Y] f32"""
    B, L = ids1_ref.shape
    two_v = wfold_ref.shape[0] - 8
    V = two_v // 2

    ids1 = ids1_ref[...]
    ids2 = ids2_ref[...]
    msk1 = m1_ref[...]
    msk2 = m2_ref[...]

    # Fused masked one-hot counts over the doubled vocab [0, 2V):
    #   counts[b, v]     = sum_l msk1[b, l] * (ids1[b, l] == v)          v <  V
    #   counts[b, V + v] = sum_l msk2[b, l] * (ids2[b, l] == v)
    vocab = lax.broadcasted_iota(jnp.int32, (B, L, two_v), 2)
    oh = jnp.where(ids1[:, :, None] == vocab, msk1[:, :, None], 0.0)
    oh = oh + jnp.where((ids2[:, :, None] + V) == vocab, msk2[:, :, None], 0.0)
    counts = jnp.sum(oh, axis=1)                                  # [B, 2V] f32

    # Single K=2V MXU dot against the folded weights; bias is a static,
    # sublane-aligned slice of the same buffer (no extra input / DMA).
    mfold = wfold_ref[0:two_v, :]                                 # [2V, Y]
    bias = wfold_ref[two_v:two_v + 1, :]                          # [1, Y]
    out_ref[...] = (
        jnp.dot(counts, mfold, preferred_element_type=jnp.float32) + bias
    )


def prepare_weights(emb, w1, b1, w2, b2):
    """One-time (load-time) eval-mode weight folding. NOT in the hot path.

    emb [V, D], w1 [2D, H], b1 [1, H], w2 [H, Y], b2 [1, Y]  (input-major).
    Returns wfold [2V + 8, Y] f32.
    """
    D = emb.shape[1]
    Y = w2.shape[1]
    m1_fold = (emb @ w1[:D]) @ w2                     # [V, Y]
    m2_fold = (emb @ w1[D:]) @ w2                     # [V, Y]
    bias = b1 @ w2 + b2                               # [1, Y]
    pad = jnp.zeros((7, Y), jnp.float32)              # sublane-align bias block
    return jnp.concatenate(
        [m1_fold, m2_fold, bias, pad], axis=0
    ).astype(jnp.float32)                             # [2V + 8, Y]


@jax.jit
def basic_causal_model_apply(ids1, m1, ids2, m2, wfold):
    """Hot path: single pallas_call. Expects ids int32, masks f32, wfold f32."""
    B = ids1.shape[0]
    Y = wfold.shape[1]
    vmem = pl.BlockSpec(memory_space=pltpu.MemorySpace.VMEM)
    return pl.pallas_call(
        causal_kernel,
        out_shape=jax.ShapeDtypeStruct((B, Y), jnp.float32),
        in_specs=[vmem, vmem, vmem, vmem, vmem],
        out_specs=vmem,
    )(ids1, m1, ids2, m2, wfold)


if __name__ == "__main__":
    # Small shapes: batch=8, seq=8, vocab(w_num)=32, w_dim=16, w_hidden=32, y_num=8
    B, L, V, D, H, Y = 8, 8, 32, 16, 32, 8
    key = jax.random.PRNGKey(0)
    k1, k2, k3, k4, k5, k6, k7, k8, k9 = jax.random.split(key, 9)

    # Data-prep (done once, correct dtypes so the hot path has zero casts).
    ids1 = jax.random.randint(k1, (B, L), 0, V, dtype=jnp.int32)
    ids2 = jax.random.randint(k2, (B, L), 0, V, dtype=jnp.int32)
    mask1 = (jax.random.uniform(k3, (B, L)) > 0.3).astype(jnp.float32)
    mask2 = (jax.random.uniform(k4, (B, L)) > 0.3).astype(jnp.float32)

    # Deterministic synthetic parameters (no checkpoint load), input-major layout.
    emb = jax.random.normal(k5, (V, D), jnp.float32) * 0.1     # word_embed.weight
    w1 = jax.random.normal(k6, (2 * D, H), jnp.float32) * 0.1  # feature2hidden
    b1 = jax.random.normal(k7, (1, H), jnp.float32) * 0.1
    w2 = jax.random.normal(k8, (H, Y), jnp.float32) * 0.1      # hidden2tag
    b2 = jax.random.normal(k9, (1, Y), jnp.float32) * 0.1

    # One-time weight folding (out of the per-call hot path).
    wfold = jax.block_until_ready(prepare_weights(emb, w1, b1, w2, b2))

    out = basic_causal_model_apply(ids1, mask1, ids2, mask2, wfold)
    out = jax.block_until_ready(out)

    # Pure-JAX reference matching the PyTorch eval-mode forward.
    x1 = emb[ids1] * mask1[..., None]
    x2 = emb[ids2] * mask2[..., None]
    ref = jnp.concatenate([x1.sum(axis=1), x2.sum(axis=1)], axis=1) @ w1 + b1
    ref = ref @ w2 + b2

    assert out.shape == (B, Y)
    assert jnp.allclose(out, ref, atol=1e-4, rtol=1e-4), "mismatch vs reference"

    print("KERNEL_OK")
</pallas_src>

<mosaic_0001>
module attributes {stable_mosaic.version = 11 : i64} {
  func.func @causal_kernel(%arg0: memref<8x8xi32, #tpu.memory_space<vmem>>, %arg1: memref<8x8xf32, #tpu.memory_space<vmem>>, %arg2: memref<8x8xi32, #tpu.memory_space<vmem>>, %arg3: memref<8x8xf32, #tpu.memory_space<vmem>>, %arg4: memref<72x8xf32, #tpu.memory_space<vmem>>, %arg5: memref<8x8xf32, #tpu.memory_space<vmem>>) attributes {dimension_semantics = [], scalar_prefetch = 0 : i64, scratch_operands = 0 : i64, tpu.core_type = #tpu.core_type<tc>} {
    %c0 = arith.constant 0 : index
    %c0_0 = arith.constant 0 : index
    %0 = vector.load %arg0[%c0, %c0_0] : memref<8x8xi32, #tpu.memory_space<vmem>>, vector<8x8xi32>
    %c0_1 = arith.constant 0 : index
    %c0_2 = arith.constant 0 : index
    %1 = vector.load %arg2[%c0_1, %c0_2] : memref<8x8xi32, #tpu.memory_space<vmem>>, vector<8x8xi32>
    %c0_3 = arith.constant 0 : index
    %c0_4 = arith.constant 0 : index
    %2 = vector.load %arg1[%c0_3, %c0_4] : memref<8x8xf32, #tpu.memory_space<vmem>>, vector<8x8xf32>
    %c0_5 = arith.constant 0 : index
    %c0_6 = arith.constant 0 : index
    %3 = vector.load %arg3[%c0_5, %c0_6] : memref<8x8xf32, #tpu.memory_space<vmem>>, vector<8x8xf32>
    %4 = tpu.iota {dimensions = array<i32: 2>} : vector<8x8x64xi32>
    %5 = vector.shape_cast %0 : vector<8x8xi32> to vector<8x8x1xi32>
    %6 = vector.broadcast %5 : vector<8x8x1xi32> to vector<8x8x64xi32>
    %7 = arith.cmpi eq, %6, %4 : vector<8x8x64xi32>
    %8 = vector.shape_cast %2 : vector<8x8xf32> to vector<8x8x1xf32>
    %cst = arith.constant 0.000000e+00 : f32
    %9 = vector.shape_cast %8 : vector<8x8x1xf32> to vector<8x8x1xf32>
    %10 = vector.broadcast %9 : vector<8x8x1xf32> to vector<8x8x64xf32>
    %11 = vector.broadcast %cst : f32 to vector<8x8x64xf32>
    %12 = arith.select %7, %10, %11 : vector<8x8x64xi1>, vector<8x8x64xf32>
    %13 = vector.shape_cast %1 : vector<8x8xi32> to vector<8x8x1xi32>
    %c32_i32 = arith.constant 32 : i32
    %14 = vector.broadcast %c32_i32 : i32 to vector<8x8x1xi32>
    %15 = arith.addi %13, %14 : vector<8x8x1xi32>
    %16 = vector.broadcast %15 : vector<8x8x1xi32> to vector<8x8x64xi32>
    %17 = arith.cmpi eq, %16, %4 : vector<8x8x64xi32>
    %18 = vector.shape_cast %3 : vector<8x8xf32> to vector<8x8x1xf32>
    %cst_7 = arith.constant 0.000000e+00 : f32
    %19 = vector.shape_cast %18 : vector<8x8x1xf32> to vector<8x8x1xf32>
    %20 = vector.broadcast %19 : vector<8x8x1xf32> to vector<8x8x64xf32>
    %21 = vector.broadcast %cst_7 : f32 to vector<8x8x64xf32>
    %22 = arith.select %17, %20, %21 : vector<8x8x64xi1>, vector<8x8x64xf32>
    %23 = arith.addf %12, %22 : vector<8x8x64xf32>
    %cst_8 = arith.constant dense<0.000000e+00> : vector<8x64xf32>
    %24 = vector.multi_reduction <add>, %23, %cst_8 [1] : vector<8x8x64xf32> to vector<8x64xf32>
    %c0_9 = arith.constant 0 : index
    %c0_10 = arith.constant 0 : index
    %25 = vector.load %arg4[%c0_9, %c0_10] : memref<72x8xf32, #tpu.memory_space<vmem>>, vector<64x8xf32>
    %c64 = arith.constant 64 : index
    %c0_11 = arith.constant 0 : index
    %26 = vector.load %arg4[%c64, %c0_11] : memref<72x8xf32, #tpu.memory_space<vmem>>, vector<1x8xf32>
    %cst_12 = arith.constant dense<0.000000e+00> : vector<8x8xf32>
    %27 = tpu.matmul %24, %25, %cst_12 {dimension_numbers = #tpu.dot_dimension_numbers<[1], [0], [0], [1], [0, 0, 1, 1], [], []>} : vector<8x64xf32>, vector<64x8xf32>, vector<8x8xf32> -> vector<8x8xf32>
    %28 = vector.broadcast %26 : vector<1x8xf32> to vector<8x8xf32>
    %29 = arith.addf %27, %28 : vector<8x8xf32>
    %c0_13 = arith.constant 0 : index
    %c0_14 = arith.constant 0 : index
    %30 = vector.load %arg5[%c0_13, %c0_14] : memref<8x8xf32, #tpu.memory_space<vmem>>, vector<8x8xf32>
    tpu.vector_store %arg5[%c0_13, %c0_14], %29 {strides = array<i32>} : memref<8x8xf32, #tpu.memory_space<vmem>>, vector<8x8xf32>,
    return
  }
}

</mosaic_0001>

<bundles_post_ra>
// kernel: basic_causal_model_apply.1
= control target key start
LH: loop header
LB: loop body
LE: loop exit
PB: predicated region body
PF: predicated region fallthrough
CT: control target
= control target key end

     0   :  { %v25_v0 = vlaneseq  ;;  %s572_s0 = inlined_call_operand.vmem [shape: s32[8,8], index: 0, kind: input, shape index: {}]   ;;  %s573_s1 = inlined_call_operand.vmem [shape: f32[8,8], index: 1, kind: input, shape index: {}]   ;;  %s574_s2 = inlined_call_operand.vmem [shape: s32[8,8], index: 2, kind: input, shape index: {}]   ;;  %s575_s3 = inlined_call_operand.vmem [shape: f32[8,8], index: 3, kind: input, shape index: {}]   ;;  %s576_s4 = inlined_call_operand.vmem [shape: f32[72,8], index: 4, kind: input, shape index: {}]   ;;  %s577_s5 = inlined_call_operand.hbm [shape: f32[8,8], index: 5, kind: output, shape index: {}]  }
   0x2   :  { %v29_v1 = vshrl.u32 %v25_v0, 7 }
   0x3   :  { %10 = vsyncpa [#allocation3], 0  ;;  %v22_v2 = vld [vmem:[%s574_s2] sm:$0xff]  ;;  %v505_v38 = vand.u32 127, %v25_v0  ;;  %vm299_vm5 = vcmask 523264   ;;  %vm374_vm6 = vcmask 1041409  }
   0x4   :  { %432 = vset.pattern.permute.xlu2 %v29_v1  ;;  %431 = vset.pattern.permute.xlu1 %v29_v1  ;;  %v21_v3 = vld [vmem:[%s572_s0] sm:$0xff]  ;;  %v169_v4 = vperm.slane %v22_v2, 2  ;;  %v155_v6 = vperm.slane %v22_v2, 0  ;;  %v176_v7 = vperm.slane %v22_v2, 3  ;;  %v162_v9 = vperm.slane %v22_v2, 1  ;;  %s460_s15 = smov [#allocation2]  }
   0x5   :  { %430 = vset.pattern.permute.xlu0 %v29_v1  ;;  %v34_v5 = vperm.slane %v21_v3, 1  ;;  %v27_v8 = vperm.slane %v21_v3, 0  ;;  %v23_v10 = vld [vmem:[%s573_s1] sm:$0xff]  ;;  %v41_v13 = vperm.slane %v21_v3, 2  ;;  %v183_v17 = vperm.slane %v22_v2, 4  ;;  %s417_s16 = sshll.u32 %s460_s15, 4  ;;  %s418_s16 = int_to_ptr.vmem [resolvable:$true] %s417_s16 }
   0x6   :  { %v98_v11 = vperm.slane %v23_v10, 1  ;;  %v91_v12 = vperm.slane %v23_v10, 0  ;;  %v24_v14 = vld [vmem:[%s575_s3] sm:$0xff]  ;;  %v190_v18 = vperm.slane %v22_v2, 5  ;;  %v105_v19 = vperm.slane %v23_v10, 2  ;;  %s419_s19 = sshll.u32 %s577_s5, 4  ;;  %s420_s19 = int_to_ptr.hbm [resolvable:$true] %s419_s19 }
   0x7   :  { %v234_v15 = vperm.slane %v24_v14, 1  ;;  %v227_v16 = vperm.slane %v24_v14, 0  ;;  %v48_v20 = vperm.slane %v21_v3, 3  ;;  %v112_v21 = vperm.slane %v23_v10, 3 }
   0x8   :  { %v55_v22 = vperm.slane %v21_v3, 4  ;;  %v241_v23 = vperm.slane %v24_v14, 2  ;;  %v62_v24 = vperm.slane %v21_v3, 5  ;;  %v248_v25 = vperm.slane %v24_v14, 3 }
   0x9   :  { %v197_v26 = vperm.slane %v22_v2, 6  ;;  %v255_v27 = vperm.slane %v24_v14, 4  ;;  %v204_v28 = vperm.slane %v22_v2, 7  ;;  %v119_v29 = vperm.slane %v23_v10, 4 }
   0xa   :  { %v262_v30 = vperm.slane %v24_v14, 5  ;;  %v126_v31 = vperm.slane %v23_v10, 5  ;;  %v69_v32 = vperm.slane %v21_v3, 6  ;;  %v269_v33 = vperm.slane %v24_v14, 6 }
   0xb   :  { %v133_v34 = vperm.slane %v23_v10, 6  ;;  %v76_v35 = vperm.slane %v21_v3, 7  ;;  %v276_v36 = vperm.slane %v24_v14, 7  ;;  %v140_v37 = vperm.slane %v23_v10, 7 }
   0xc   :  { %174 = vperm.xlu1 %431, %v169_v4   ;;  %39 = vperm.xlu2 %432, %v34_v5   ;;  %vm376_vm10 = vcmask 1042434   ;;  %vm378_vm13 = vcmask 1043459  }
   0xd   :  { %160 = vperm.xlu0 %430, %v155_v6  }
  0x14   :  { %181 = vperm.xlu2 %432, %v176_v7   ;;  %32 = vperm.xlu1 %431, %v27_v8  }
  0x15   :  { %167 = vperm.xlu0 %430, %v162_v9  }
  0x1c   :  { %103 = vperm.xlu2 %432, %v98_v11   ;;  %96 = vperm.xlu1 %431, %v91_v12  }
  0x1d   :  { %46 = vperm.xlu0 %430, %v41_v13  }
  0x24   :  { %239 = vperm.xlu2 %432, %v234_v15   ;;  %232 = vperm.xlu1 %431, %v227_v16  }
  0x25   :  { %188 = vperm.xlu0 %430, %v183_v17  }
  0x2c   :  { %195 = vperm.xlu2 %432, %v190_v18   ;;  %110 = vperm.xlu1 %431, %v105_v19  }
  0x2d   :  { %53 = vperm.xlu0 %430, %v48_v20  }
  0x34   :  { %117 = vperm.xlu2 %432, %v112_v21   ;;  %60 = vperm.xlu1 %431, %v55_v22  }
  0x35   :  { %246 = vperm.xlu0 %430, %v241_v23  }
  0x3c   :  { %67 = vperm.xlu2 %432, %v62_v24   ;;  %253 = vperm.xlu1 %431, %v248_v25  }
  0x3d   :  { %202 = vperm.xlu0 %430, %v197_v26  }
  0x44   :  { %260 = vperm.xlu2 %432, %v255_v27   ;;  %209 = vperm.xlu1 %431, %v204_v28  }
  0x45   :  { %124 = vperm.xlu0 %430, %v119_v29  }
  0x4c   :  { %267 = vperm.xlu2 %432, %v262_v30   ;;  %131 = vperm.xlu1 %431, %v126_v31   ;;  %v363_v31 = vld [vmem:[%s576_s4 + $0x38] sm:$0xff] }
  0x4d   :  { %74 = vperm.xlu0 %430, %v69_v32   ;;  %398 = vmatpush.msra.mxu0 %v363_v31 }
  0x54   :  { %274 = vperm.xlu2 %432, %v269_v33   ;;  %138 = vperm.xlu1 %431, %v133_v34  }
  0x55   :  { %81 = vperm.xlu0 %430, %v76_v35  }
  0x5c   :  { %281 = vperm.xlu1 %431, %v276_v36  }
  0x5d   :  { %145 = vperm.xlu0 %430, %v140_v37   ;;  %v362_v37 = vld [vmem:[%s576_s4 + $0x30] sm:$0xff] }
  0x5e   :  { %399 = vmatpush.msra.mxu0 %v362_v37 }
  0x66   :  { %v40_v39 = vpop.permute.xlu2 %39 }
  0x67   :  { %vm84_vm0 = vcmp.eq.s32.totalorder %v40_v39, %v505_v38 }
  0x6e   :  { %v182_v40 = vpop.permute.xlu2 %181 }
  0x6f   :  { %v214_v21 = vadd.s32 32, %v182_v40 }
  0x71   :  { %vm222_vm9 = vcmp.eq.s32.totalorder %v214_v21, %v505_v38 }
  0x76   :  { %v104_v44 = vpop.permute.xlu2 %103 }
  0x77   :  { %v148_v50 = vsel %vm84_vm0, %v104_v44, 0.0 }
  0x7e   :  { %v175_v41 = vpop.permute.xlu1 %174  ;;  %v240_v49 = vpop.permute.xlu2 %239 }
  0x7f   :  { %v213_v42 = vadd.s32 32, %v175_v41  ;;  %v161_v43 = vpop.permute.xlu0 %160  ;;  %v361_v41 = vld [vmem:[%s576_s4 + $0x28] sm:$0xff] }
  0x80   :  { %v211_v45 = vadd.s32 32, %v161_v43  ;;  %400 = vmatpush.msra.mxu0 %v361_v41 }
  0x81   :  { %vm221_vm1 = vcmp.eq.s32.totalorder %v213_v42, %v505_v38 }
  0x82   :  { %vm219_vm2 = vcmp.eq.s32.totalorder %v211_v45, %v505_v38 }
  0x86   :  { %v33_v46 = vpop.permute.xlu1 %32  ;;  %v513_v57 = vpop.permute.xlu2 %195 }
  0x87   :  { %v168_v47 = vpop.permute.xlu0 %167  ;;  %vm83_vm3 = vcmp.eq.s32.totalorder %v33_v46, %v505_v38  ;;  %v360_v46 = vld [vmem:[%s576_s4 + $0x20] sm:$0xff] }
  0x88   :  { %v212_v48 = vadd.s32 32, %v168_v47  ;;  %401 = vmatpush.msra.mxu0 %v360_v46 }
  0x8a   :  { %vm220_vm4 = vcmp.eq.s32.totalorder %v212_v48, %v505_v38 }
  0x8b   :  { %v284_v51 = vsel %vm220_vm4, %v240_v49, 0.0 }
  0x8c   :  { %v292_v52 = vadd.f32 %v284_v51, %v148_v50 }
  0x8e   :  { %v307_v53 = vsel %vm299_vm5, %v292_v52, 0.0  ;;  %v97_v54 = vpop.permute.xlu1 %96  ;;  %v118_v5 = vpop.permute.xlu2 %117  ;;  %v359_v52 = vld [vmem:[%s576_s4 + $0x18] sm:$0xff] }
  0x8f   :  { %v47_v55 = vpop.permute.xlu0 %46  ;;  %v308_v56 = vrot.slane %v307_v53, 4  ;;  %v147_v60 = vsel %vm83_vm3, %v97_v54, 0.0  ;;  %402 = vmatpush.msra.mxu0 %v359_v52  ;;  %v358_v54 = vld [vmem:[%s576_s4 + $0x10] sm:$0xff]  ;;  %vm382_vm3 = vcmask 1045509  }
  0x90   :  { %vm85_vm7 = vcmp.eq.s32.totalorder %v47_v55, %v505_v38 }
  0x91   :  { %v309_v58 = vadd.f32 %v308_v56, %v307_v53  ;;  %v216_v53 = vadd.s32 32, %v513_v57  ;;  %403 = vmatpush.msra.mxu0 %v358_v54  ;;  %v356_v57 = vld [vmem:[%s576_s4] sm:$0xff] }
  0x93   :  { %v310_v0 = vrot.slane %v309_v58, 2  ;;  %vm224_vm15 = vcmp.eq.s32.totalorder %v216_v53, %v505_v38 }
  0x95   :  { %v311_v3 = vadd.f32 %v310_v0, %v309_v58  ;;  %v357_v58 = vld [vmem:[%s576_s4 + $0x8] sm:$0xff] }
  0x96   :  { %v233_v59 = vpop.permute.xlu1 %232  ;;  %v519_v17 = vpop.permute.xlu2 %67  ;;  %404 = vmatpush.msra.mxu0 %v357_v58 }
  0x97   :  { %v189_v61 = vpop.permute.xlu0 %188  ;;  %v283_v62 = vsel %vm219_vm2, %v233_v59, 0.0  ;;  %v312_v9 = vrot.slane %v311_v3, 1  ;;  %vm88_vm14 = vcmp.eq.s32.totalorder %v519_v17, %v505_v38 }
  0x98   :  { %v291_v63 = vadd.f32 %v283_v62, %v147_v60  ;;  %v215_v35 = vadd.s32 32, %v189_v61  ;;  %405 = vmatpush.msra.mxu0 %v356_v57 }
  0x99   :  { %v313_v12 = vadd.f32 %v312_v9, %v311_v3 }
  0x9a   :  { %v300_v1 = vsel %vm299_vm5, %v291_v63, 0.0  ;;  %vm223_vm11 = vcmp.eq.s32.totalorder %v215_v35, %v505_v38 }
  0x9b   :  { %v301_v2 = vrot.slane %v300_v1, 4 }
  0x9d   :  { %v302_v4 = vadd.f32 %v301_v2, %v300_v1 }
  0x9e   :  { %v111_v6 = vpop.permute.xlu1 %110  ;;  %v261_v32 = vpop.permute.xlu2 %260 }
  0x9f   :  { %v303_v7 = vrot.slane %v302_v4, 2  ;;  %v54_v8 = vpop.permute.xlu0 %53  ;;  %v149_v18 = vsel %vm85_vm7, %v111_v6, 0.0  ;;  %v287_v47 = vsel %vm223_vm11, %v261_v32, 0.0  ;;  %vm384_vm7 = vcmask 1046534  }
  0xa0   :  { %vm86_vm8 = vcmp.eq.s32.totalorder %v54_v8, %v505_v38 }
  0xa1   :  { %v304_v10 = vadd.f32 %v303_v7, %v302_v4  ;;  %v150_v26 = vsel %vm86_vm8, %v118_v5, 0.0  ;;  %vm386_vm8 = vcmask 1047559  }
  0xa3   :  { %v305_v11 = vrot.slane %v304_v10, 1 }
  0xa5   :  { %v306_v13 = vadd.f32 %v305_v11, %v304_v10 }
  0xa6   :  { %v61_v14 = vpop.permute.xlu1 %60  ;;  %v268_v59 = vpop.permute.xlu2 %267 }
  0xa7   :  { %v375_v15 = vsel %vm374_vm6, %v313_v12, %v306_v13  ;;  %v247_v16 = vpop.permute.xlu0 %246  ;;  %vm87_vm12 = vcmp.eq.s32.totalorder %v61_v14, %v505_v38  ;;  %v288_v0 = vsel %vm224_vm15, %v268_v59, 0.0 }
  0xa8   :  { %v285_v19 = vsel %vm221_vm1, %v247_v16, 0.0  ;;  %vm380_vm1 = vcmask 1044484  }
  0xa9   :  { %v293_v20 = vadd.f32 %v285_v19, %v149_v18 }
  0xab   :  { %v314_v22 = vsel %vm299_vm5, %v293_v20, 0.0 }
  0xac   :  { %v315_v23 = vrot.slane %v314_v22, 4 }
  0xae   :  { %v316_v24 = vadd.f32 %v315_v23, %v314_v22  ;;  %v254_v25 = vpop.permute.xlu1 %253  ;;  %v275_v12 = vpop.permute.xlu2 %274 }
  0xaf   :  { %v203_v27 = vpop.permute.xlu0 %202  ;;  %v286_v28 = vsel %vm222_vm9, %v254_v25, 0.0  ;;  %vm410_vm9 = vcmask 64512  }
  0xb0   :  { %v317_v29 = vrot.slane %v316_v24, 2  ;;  %v294_v30 = vadd.f32 %v286_v28, %v150_v26  ;;  %v217_v4 = vadd.s32 32, %v203_v27 }
  0xb2   :  { %v318_v33 = vadd.f32 %v317_v29, %v316_v24  ;;  %v321_v34 = vsel %vm299_vm5, %v294_v30, 0.0  ;;  %vm225_vm0 = vcmp.eq.s32.totalorder %v217_v4, %v505_v38 }
  0xb3   :  { %v322_v36 = vrot.slane %v321_v34, 4 }
  0xb4   :  { %v319_v39 = vrot.slane %v318_v33, 1 }
  0xb5   :  { %v323_v40 = vadd.f32 %v322_v36, %v321_v34 }
  0xb6   :  { %v320_v42 = vadd.f32 %v319_v39, %v318_v33  ;;  %v210_v43 = vpop.permute.xlu1 %209 }
  0xb7   :  { %v324_v44 = vrot.slane %v323_v40, 2  ;;  %v125_v45 = vpop.permute.xlu0 %124  ;;  %v218_v22 = vadd.s32 32, %v210_v43 }
  0xb8   :  { %v151_v48 = vsel %vm87_vm12, %v125_v45, 0.0  ;;  %v377_v49 = vsel %vm376_vm10, %v320_v42, %v375_v15  ;;  %v289_v15 = vsel %vm225_vm0, %v275_v12, 0.0 }
  0xb9   :  { %v325_v50 = vadd.f32 %v324_v44, %v323_v40  ;;  %v295_v51 = vadd.f32 %v287_v47, %v151_v48  ;;  %vm226_vm4 = vcmp.eq.s32.totalorder %v218_v22, %v505_v38  ;;  %v433_v47 = vld [vmem:[%s576_s4 + $0x40] ss:$0 sm:$0xff] }
  0xbb   :  { %v326_v55 = vrot.slane %v325_v50, 1  ;;  %v328_v56 = vsel %vm299_vm5, %v295_v51, 0.0 }
  0xbc   :  { %v329_v60 = vrot.slane %v328_v56, 4 }
  0xbd   :  { %v327_v61 = vadd.f32 %v326_v55, %v325_v50 }
  0xbe   :  { %v330_v62 = vadd.f32 %v329_v60, %v328_v56  ;;  %v132_v63 = vpop.permute.xlu1 %131 }
  0xbf   :  { %v75_v1 = vpop.permute.xlu0 %74  ;;  %v152_v2 = vsel %vm88_vm14, %v132_v63, 0.0  ;;  %v379_v3 = vsel %vm378_vm13, %v327_v61, %v377_v49 }
  0xc0   :  { %v331_v5 = vrot.slane %v330_v62, 2  ;;  %v296_v6 = vadd.f32 %v288_v0, %v152_v2  ;;  %vm89_vm2 = vcmp.eq.s32.totalorder %v75_v1, %v505_v38 }
  0xc2   :  { %v332_v7 = vadd.f32 %v331_v5, %v330_v62  ;;  %v335_v8 = vsel %vm299_vm5, %v296_v6, 0.0 }
  0xc3   :  { %v336_v9 = vrot.slane %v335_v8, 4 }
  0xc4   :  { %v333_v10 = vrot.slane %v332_v7, 1 }
  0xc5   :  { %v337_v11 = vadd.f32 %v336_v9, %v335_v8 }
  0xc6   :  { %v334_v13 = vadd.f32 %v333_v10, %v332_v7  ;;  %v139_v14 = vpop.permute.xlu1 %138 }
  0xc7   :  { %v338_v16 = vrot.slane %v337_v11, 2  ;;  %v82_v17 = vpop.permute.xlu0 %81  ;;  %v153_v18 = vsel %vm89_vm2, %v139_v14, 0.0 }
  0xc8   :  { %v297_v19 = vadd.f32 %v289_v15, %v153_v18  ;;  %v381_v20 = vsel %vm380_vm1, %v334_v13, %v379_v3  ;;  %vm90_vm6 = vcmp.eq.s32.totalorder %v82_v17, %v505_v38 }
  0xc9   :  { %v339_v21 = vadd.f32 %v338_v16, %v337_v11 }
  0xca   :  { %v342_v23 = vsel %vm299_vm5, %v297_v19, 0.0 }
  0xcb   :  { %v340_v24 = vrot.slane %v339_v21, 1  ;;  %v343_v25 = vrot.slane %v342_v23, 4 }
  0xcd   :  { %v341_v26 = vadd.f32 %v340_v24, %v339_v21  ;;  %v344_v27 = vadd.f32 %v343_v25, %v342_v23 }
  0xce   :  { %v282_v28 = vpop.permute.xlu1 %281 }
  0xcf   :  { %v345_v29 = vrot.slane %v344_v27, 2  ;;  %v146_v30 = vpop.permute.xlu0 %145  ;;  %v290_v31 = vsel %vm226_vm4, %v282_v28, 0.0  ;;  %v383_v32 = vsel %vm382_vm3, %v341_v26, %v381_v20 }
  0xd0   :  { %v154_v33 = vsel %vm90_vm6, %v146_v30, 0.0 }
  0xd1   :  { %v346_v34 = vadd.f32 %v345_v29, %v344_v27  ;;  %v298_v35 = vadd.f32 %v290_v31, %v154_v33 }
  0xd3   :  { %v347_v36 = vrot.slane %v346_v34, 1  ;;  %v349_v37 = vsel %vm299_vm5, %v298_v35, 0.0 }
  0xd4   :  { %v350_v39 = vrot.slane %v349_v37, 4 }
  0xd5   :  { %v348_v40 = vadd.f32 %v347_v36, %v346_v34 }
  0xd6   :  { %v351_v41 = vadd.f32 %v350_v39, %v349_v37 }
  0xd7   :  { %v385_v42 = vsel %vm384_vm7, %v348_v40, %v383_v32 }
  0xd8   :  { %v352_v43 = vrot.slane %v351_v41, 2 }
  0xda   :  { %v353_v44 = vadd.f32 %v352_v43, %v351_v41 }
  0xdc   :  { %v354_v45 = vrot.slane %v353_v44, 1 }
  0xde   :  { %v355_v38 = vadd.f32 %v354_v45, %v353_v44 }
  0xe0   :  { %v387_v46 = vsel %vm386_vm8, %v355_v38, %v385_v42 }
  0xe1   :  { %428 = vmatmul.msk.f32.vlgmr.msra.gmra.mxu0 %vm299_vm5, %v387_v46 }
 0x15e   :  { %v407_v48 = vpop.f32.mrf.mxu0 }
 0x15f   :  { %v408_v49 = vadd.f32 %v433_v47, %v407_v48 }
 0x161   :  { %411 = vst.msk [vmem:[#allocation2] sm:$0xff] %vm410_vm9, %v408_v49 }
 0x162   :  { %422 = dma.vmem_to_hbm [thread:$0]  %s418_s16, 128, %s420_s19, [#allocation3]  }
 0x163   :  { %458 = dma.done.wait [#allocation3], 128  }
 0x164   :  { %459 = vsyncadd [#allocation3], 4294967168 }
 0x165   :  { %427 = vsyncpa [#allocation3], 1 }

</bundles_post_ra>
